<compile_context>
chip_gen: v6e
topology: v6e:2x2x1
jax: 0.10.0
libtpu: 0.0.40
codegen_flags: <defaults>
</compile_context>

<pallas_src>
import functools

import jax
import jax.numpy as jnp
import numpy as np
from jax.experimental import pallas as pl
from jax.experimental.pallas import tpu as pltpu


def se_basic_block_kernel(xsh_ref, b1_ref, b2_ref, bn1s_ref, bn1b_ref,
                          bn2s_ref, bn2b_ref, fc1_ref, fc2_ref,
                          t_ref, tpool_ref, o_ref, *, bs, H):
    """One batch chunk (bs images) per grid step.  WC = W*C (lane-dense width).

    xsh_ref : (3, bs*H, WC)  row-shifted lane-dense input (kh = 0, 1, 2);
                             the kh=1 slice is the un-shifted x == residual.
    b1/b2   : (3, WC, WC)    block-banded 3x3 conv weights (one per kh tap).
    bn1s/b  : (1, WC)        folded BN1 scale / bias, pre-tiled lane-dense.
    bn2s/b  : (1, WC)        folded BN2 scale / bias, pre-tiled lane-dense.
    fc1     : (C, hid)       SE first linear (in, out layout).
    fc2     : (hid, C)       SE second linear (in, out layout).
    t       : (C, WC)        identity-block tiling matrix (channel -> lanes).
    tpool   : (WC, C)        GAP lane-reduce matrix, includes the 1/(H*W) factor.
    o_ref   : (bs*H, WC)     lane-dense output.
    """
    M, WC = o_ref.shape

    # ---- conv1: 3 accumulating lane-dense banded matmuls (K = N = WC = 128).
    acc1 = jnp.dot(xsh_ref[0], b1_ref[0], preferred_element_type=jnp.float32)
    acc1 += jnp.dot(xsh_ref[1], b1_ref[1], preferred_element_type=jnp.float32)
    acc1 += jnp.dot(xsh_ref[2], b1_ref[2], preferred_element_type=jnp.float32)

    # bn1 + relu, fully lane-dense.
    out1 = jnp.maximum(acc1 * bn1s_ref[...] + bn1b_ref[...], 0.0)        # (M, WC)

    # ---- conv2: only 2 zero rows per image remain (W borders are zero blocks
    #      inside b2); then 3 accumulating banded matmuls over row shifts.
    zrow = jnp.zeros((bs, 1, WC), jnp.float32)
    pad1 = jnp.concatenate([zrow, out1.reshape(bs, H, WC), zrow], axis=1)  # (bs, H+2, WC)
    acc2 = jnp.dot(pad1[:, 0:H, :].reshape(M, WC), b2_ref[0],
                   preferred_element_type=jnp.float32)
    acc2 += jnp.dot(pad1[:, 1:H + 1, :].reshape(M, WC), b2_ref[1],
                    preferred_element_type=jnp.float32)
    acc2 += jnp.dot(pad1[:, 2:H + 2, :].reshape(M, WC), b2_ref[2],
                    preferred_element_type=jnp.float32)

    # bn2, lane-dense.
    out2 = acc2 * bn2s_ref[...] + bn2b_ref[...]                          # (M, WC)

    # ---- SE: global average pool = sublane sum over H + lane reduce over W
    #      via the pooling matrix (MXU is otherwise idle here); fc1 -> relu ->
    #      fc2 -> sigmoid on the VPU/EUP; lane-broadcast the per-channel scale
    #      back to WC lanes with the tiling matrix (again on the MXU).
    y_h = out2.reshape(bs, H, WC).sum(axis=1)                            # (bs, WC)
    y_c = jnp.dot(y_h, tpool_ref[...], preferred_element_type=jnp.float32)   # (bs, C)
    h = jnp.maximum(
        jnp.sum(y_c[:, :, None] * fc1_ref[...][None, :, :], axis=1), 0.0)    # (bs, hid)
    s = jax.nn.sigmoid(
        jnp.sum(h[:, :, None] * fc2_ref[...][None, :, :], axis=1))           # (bs, C)
    s_wc = jnp.dot(s, t_ref[...], preferred_element_type=jnp.float32)        # (bs, WC)
    s_ld = jnp.broadcast_to(s_wc.reshape(bs, 1, WC), (bs, H, WC)).reshape(M, WC)

    # ---- channel scale + residual (xsh[1] == un-shifted lane-dense x) + relu.
    out = jnp.maximum(out2 * s_ld + xsh_ref[1], 0.0)
    o_ref[...] = out.astype(o_ref.dtype)


def se_basic_block(x_nhwc, w1_hwio, w2_hwio, bn1_scale, bn1_bias,
                   bn2_scale, bn2_bias, fc1_k, fc2_k, *, num_steps=1):
    """x_nhwc: (B,H,W,C); conv weights HWIO (3,3,C,C); bn params per-channel;
    fc1_k: (C, hidden); fc2_k: (hidden, C).  Returns NHWC output.

    num_steps splits the batch across the grid.  Default 1: v5e/v6e have a
    single TensorCore (the grid is a serial loop) so extra steps only add
    ~0.35us/step and halve matmul M.  For big batches grow the per-step chunk
    (target M >= ~2048) rather than the grid.
    """
    B, H, W, C = x_nhwc.shape
    assert w1_hwio.shape == (3, 3, C, C) and w2_hwio.shape == (3, 3, C, C), (
        "inplanes must equal planes (no downsample), 3x3 kernels")
    hidden = fc1_k.shape[1]
    WC = W * C
    assert B % num_steps == 0
    bs = B // num_steps
    M = bs * H

    # -------- plain-JAX / numpy glue (layout plumbing only) --------

    # Row-shifted lane-dense input: xsh[kh] = rows (h + kh) of the h-padded image.
    xpad3 = jnp.pad(x_nhwc.reshape(B, H, WC).astype(jnp.float32),
                    ((0, 0), (1, 1), (0, 0)))                            # (B, H+2, WC)
    xsh = jnp.stack([xpad3[:, kh:kh + H, :] for kh in range(3)],
                    axis=0).reshape(3, B * H, WC)                        # (3, B*H, WC)

    # Block-banded conv weights:
    #   b[kh][win*C+ci, wout*C+co] = w[kh, win-wout+1, ci, co] if |win-wout|<=1 else 0
    # (zero blocks at the W borders implement the SAME padding along W).
    P = np.zeros((3, W, W), np.float32)
    for kw in range(3):
        for wout in range(W):
            win = wout + kw - 1
            if 0 <= win < W:
                P[kw, win, wout] = 1.0
    P = jnp.asarray(P)

    def banded(w_hwio):
        return jnp.einsum('akio,kvu->aviuo', w_hwio.astype(jnp.float32),
                          P).reshape(3, WC, WC)

    b1 = banded(w1_hwio)
    b2 = banded(w2_hwio)

    # Lane-dense (pre-tiled) folded-BN scale / bias.
    bn1s = jnp.tile(jnp.asarray(bn1_scale, jnp.float32).reshape(C), W)[None, :]
    bn1b = jnp.tile(jnp.asarray(bn1_bias, jnp.float32).reshape(C), W)[None, :]
    bn2s = jnp.tile(jnp.asarray(bn2_scale, jnp.float32).reshape(C), W)[None, :]
    bn2b = jnp.tile(jnp.asarray(bn2_bias, jnp.float32).reshape(C), W)[None, :]

    # SE lane-broadcast / lane-reduce matrices (identity blocks).
    t_mat = jnp.asarray(np.tile(np.eye(C, dtype=np.float32), (1, W)))    # (C, WC)
    tpool = t_mat.T / float(H * W)                                       # (WC, C)

    grid_spec = pltpu.PrefetchScalarGridSpec(
        num_scalar_prefetch=0,
        grid=(num_steps,),
        in_specs=[
            pl.BlockSpec((3, M, WC), lambda g: (0, g, 0)),    # xsh (per-chunk)
            pl.BlockSpec((3, WC, WC), lambda g: (0, 0, 0)),   # b1
            pl.BlockSpec((3, WC, WC), lambda g: (0, 0, 0)),   # b2
            pl.BlockSpec((1, WC), lambda g: (0, 0)),          # bn1 scale
            pl.BlockSpec((1, WC), lambda g: (0, 0)),          # bn1 bias
            pl.BlockSpec((1, WC), lambda g: (0, 0)),          # bn2 scale
            pl.BlockSpec((1, WC), lambda g: (0, 0)),          # bn2 bias
            pl.BlockSpec((C, hidden), lambda g: (0, 0)),      # fc1
            pl.BlockSpec((hidden, C), lambda g: (0, 0)),      # fc2
            pl.BlockSpec((C, WC), lambda g: (0, 0)),          # t (broadcast)
            pl.BlockSpec((WC, C), lambda g: (0, 0)),          # tpool (GAP)
        ],
        out_specs=pl.BlockSpec((M, WC), lambda g: (g, 0)),
    )

    kernel = functools.partial(se_basic_block_kernel, bs=bs, H=H)
    out_ld = pl.pallas_call(
        kernel,
        out_shape=jax.ShapeDtypeStruct((B * H, WC), x_nhwc.dtype),
        grid_spec=grid_spec,
        compiler_params=pltpu.CompilerParams(
            dimension_semantics=("arbitrary",)),
    )(xsh, b1, b2, bn1s, bn1b, bn2s, bn2b,
      fc1_k.astype(jnp.float32), fc2_k.astype(jnp.float32), t_mat, tpool)

    return out_ld.reshape(B, H, W, C)


# ---------------- pure-JAX reference (for a correctness check) ----------------
def reference_forward(x_nhwc, w1_hwio, w2_hwio, bn1_scale, bn1_bias,
                      bn2_scale, bn2_bias, fc1_k, fc2_k):
    dn = ('NHWC', 'HWIO', 'NHWC')
    out = jax.lax.conv_general_dilated(x_nhwc, w1_hwio, (1, 1), 'SAME',
                                       dimension_numbers=dn)
    out = jnp.maximum(out * bn1_scale + bn1_bias, 0.0)
    out = jax.lax.conv_general_dilated(out, w2_hwio, (1, 1), 'SAME',
                                       dimension_numbers=dn)
    out = out * bn2_scale + bn2_bias
    y = jnp.mean(out, axis=(1, 2))                 # (B, C)
    y = jnp.maximum(y @ fc1_k, 0.0)
    y = jax.nn.sigmoid(y @ fc2_k)                  # (B, C)
    out = out * y[:, None, None, :]
    return jnp.maximum(out + x_nhwc, 0.0)


if __name__ == "__main__":
    key = jax.random.PRNGKey(0)
    B, C, H, W = 2, 16, 8, 8           # inplanes == planes == 16, stride=1
    reduction = 4                      # SE hidden = channel // reduction = 4
    hidden = C // reduction
    eps = 1e-5

    ks = jax.random.split(key, 12)
    # PyTorch-convention parameter shapes (then transposed for the kernel).
    x_nchw  = jax.random.normal(ks[0], (B, C, H, W), jnp.float32)
    w1_oihw = jax.random.normal(ks[1], (C, C, 3, 3), jnp.float32) * 0.1
    w2_oihw = jax.random.normal(ks[2], (C, C, 3, 3), jnp.float32) * 0.1
    gamma1  = 1.0 + 0.1 * jax.random.normal(ks[3], (C,), jnp.float32)
    beta1   = 0.1 * jax.random.normal(ks[4], (C,), jnp.float32)
    mean1   = 0.1 * jax.random.normal(ks[5], (C,), jnp.float32)
    var1    = jnp.abs(jax.random.normal(ks[6], (C,), jnp.float32)) + 0.5
    gamma2  = 1.0 + 0.1 * jax.random.normal(ks[7], (C,), jnp.float32)
    beta2   = 0.1 * jax.random.normal(ks[8], (C,), jnp.float32)
    mean2   = 0.1 * jax.random.normal(ks[9], (C,), jnp.float32)
    var2    = jnp.abs(jax.random.normal(ks[10], (C,), jnp.float32)) + 0.5
    fkeys = jax.random.split(ks[11], 2)
    fc1_w = jax.random.normal(fkeys[0], (hidden, C), jnp.float32) * 0.3  # (out,in)
    fc2_w = jax.random.normal(fkeys[1], (C, hidden), jnp.float32) * 0.3  # (out,in)

    # Layout conversion glue: NCHW -> NHWC, OIHW -> HWIO, Linear (out,in) -> (in,out).
    x_nhwc  = jnp.transpose(x_nchw, (0, 2, 3, 1))
    w1_hwio = jnp.transpose(w1_oihw, (2, 3, 1, 0))
    w2_hwio = jnp.transpose(w2_oihw, (2, 3, 1, 0))
    fc1_k = fc1_w.T          # (C, hidden)
    fc2_k = fc2_w.T          # (hidden, C)

    # Fold eval-mode BatchNorm into per-channel scale/bias.
    # TODO(synk): training-mode BatchNorm (running-stat update) is not expressed here.
    bn1_scale = gamma1 / jnp.sqrt(var1 + eps)
    bn1_bias  = beta1 - mean1 * bn1_scale
    bn2_scale = gamma2 / jnp.sqrt(var2 + eps)
    bn2_bias  = beta2 - mean2 * bn2_scale

    out_nhwc = se_basic_block(x_nhwc, w1_hwio, w2_hwio, bn1_scale, bn1_bias,
                              bn2_scale, bn2_bias, fc1_k, fc2_k)
    out_nhwc = jax.block_until_ready(out_nhwc)

    ref = reference_forward(x_nhwc, w1_hwio, w2_hwio, bn1_scale, bn1_bias,
                            bn2_scale, bn2_bias, fc1_k, fc2_k)
    assert jnp.allclose(out_nhwc, ref, atol=1e-4, rtol=1e-4), (
        float(jnp.max(jnp.abs(out_nhwc - ref))))

    # Back to PyTorch NCHW layout for the final result (glue only).
    out_nchw = jnp.transpose(out_nhwc, (0, 3, 1, 2))
    jax.block_until_ready(out_nchw)
    print("KERNEL_OK")
</pallas_src>

<mosaic_0001>
module attributes {stable_mosaic.version = 11 : i64} {
  func.func @se_basic_block_kernel(%arg0: i32, %arg1: memref<3x16x128xf32, #tpu.memory_space<vmem>>, %arg2: memref<3x128x128xf32, #tpu.memory_space<vmem>>, %arg3: memref<3x128x128xf32, #tpu.memory_space<vmem>>, %arg4: memref<1x128xf32, #tpu.memory_space<vmem>>, %arg5: memref<1x128xf32, #tpu.memory_space<vmem>>, %arg6: memref<1x128xf32, #tpu.memory_space<vmem>>, %arg7: memref<1x128xf32, #tpu.memory_space<vmem>>, %arg8: memref<16x4xf32, #tpu.memory_space<vmem>>, %arg9: memref<4x16xf32, #tpu.memory_space<vmem>>, %arg10: memref<16x128xf32, #tpu.memory_space<vmem>>, %arg11: memref<128x16xf32, #tpu.memory_space<vmem>>, %arg12: memref<16x128xf32, #tpu.memory_space<vmem>>) attributes {dimension_semantics = [#tpu.dimension_semantics<arbitrary>], iteration_bounds = array<i64: 1>, scalar_prefetch = 0 : i64, scratch_operands = 0 : i64, tpu.core_type = #tpu.core_type<tc>, window_params = [{transform_indices = @transform_0, window_bounds = array<i64: 3, 16, 128>}, {pipeline_mode = #tpu.pipeline_mode<synchronous>, transform_indices = @transform_1, window_bounds = array<i64: 3, 128, 128>}, {pipeline_mode = #tpu.pipeline_mode<synchronous>, transform_indices = @transform_2, window_bounds = array<i64: 3, 128, 128>}, {pipeline_mode = #tpu.pipeline_mode<synchronous>, transform_indices = @transform_3, window_bounds = array<i64: 1, 128>}, {pipeline_mode = #tpu.pipeline_mode<synchronous>, transform_indices = @transform_4, window_bounds = array<i64: 1, 128>}, {pipeline_mode = #tpu.pipeline_mode<synchronous>, transform_indices = @transform_5, window_bounds = array<i64: 1, 128>}, {pipeline_mode = #tpu.pipeline_mode<synchronous>, transform_indices = @transform_6, window_bounds = array<i64: 1, 128>}, {pipeline_mode = #tpu.pipeline_mode<synchronous>, transform_indices = @transform_7, window_bounds = array<i64: 16, 4>}, {pipeline_mode = #tpu.pipeline_mode<synchronous>, transform_indices = @transform_8, window_bounds = array<i64: 4, 16>}, {pipeline_mode = #tpu.pipeline_mode<synchronous>, transform_indices = @transform_9, window_bounds = array<i64: 16, 128>}, {pipeline_mode = #tpu.pipeline_mode<synchronous>, transform_indices = @transform_10, window_bounds = array<i64: 128, 16>}, {transform_indices = @transform_11, window_bounds = array<i64: 16, 128>}]} {
    %c0 = arith.constant 0 : index
    %c0_0 = arith.constant 0 : index
    %c0_1 = arith.constant 0 : index
    %0 = vector.load %arg1[%c0, %c0_0, %c0_1] : memref<3x16x128xf32, #tpu.memory_space<vmem>>, vector<1x16x128xf32>
    %1 = vector.shape_cast %0 : vector<1x16x128xf32> to vector<16x128xf32>
    %c0_2 = arith.constant 0 : index
    %c0_3 = arith.constant 0 : index
    %c0_4 = arith.constant 0 : index
    %2 = vector.load %arg2[%c0_2, %c0_3, %c0_4] : memref<3x128x128xf32, #tpu.memory_space<vmem>>, vector<1x128x128xf32>
    %3 = vector.shape_cast %2 : vector<1x128x128xf32> to vector<128x128xf32>
    %cst = arith.constant dense<0.000000e+00> : vector<16x128xf32>
    %4 = tpu.matmul %1, %3, %cst {dimension_numbers = #tpu.dot_dimension_numbers<[1], [0], [0], [1], [0, 0, 1, 1], [], []>} : vector<16x128xf32>, vector<128x128xf32>, vector<16x128xf32> -> vector<16x128xf32>
    %c1 = arith.constant 1 : index
    %c0_5 = arith.constant 0 : index
    %c0_6 = arith.constant 0 : index
    %5 = vector.load %arg1[%c1, %c0_5, %c0_6] : memref<3x16x128xf32, #tpu.memory_space<vmem>>, vector<1x16x128xf32>
    %6 = vector.shape_cast %5 : vector<1x16x128xf32> to vector<16x128xf32>
    %c1_7 = arith.constant 1 : index
    %c0_8 = arith.constant 0 : index
    %c0_9 = arith.constant 0 : index
    %7 = vector.load %arg2[%c1_7, %c0_8, %c0_9] : memref<3x128x128xf32, #tpu.memory_space<vmem>>, vector<1x128x128xf32>
    %8 = vector.shape_cast %7 : vector<1x128x128xf32> to vector<128x128xf32>
    %cst_10 = arith.constant dense<0.000000e+00> : vector<16x128xf32>
    %9 = tpu.matmul %6, %8, %cst_10 {dimension_numbers = #tpu.dot_dimension_numbers<[1], [0], [0], [1], [0, 0, 1, 1], [], []>} : vector<16x128xf32>, vector<128x128xf32>, vector<16x128xf32> -> vector<16x128xf32>
    %10 = arith.addf %4, %9 : vector<16x128xf32>
    %c2 = arith.constant 2 : index
    %c0_11 = arith.constant 0 : index
    %c0_12 = arith.constant 0 : index
    %11 = vector.load %arg1[%c2, %c0_11, %c0_12] : memref<3x16x128xf32, #tpu.memory_space<vmem>>, vector<1x16x128xf32>
    %12 = vector.shape_cast %11 : vector<1x16x128xf32> to vector<16x128xf32>
    %c2_13 = arith.constant 2 : index
    %c0_14 = arith.constant 0 : index
    %c0_15 = arith.constant 0 : index
    %13 = vector.load %arg2[%c2_13, %c0_14, %c0_15] : memref<3x128x128xf32, #tpu.memory_space<vmem>>, vector<1x128x128xf32>
    %14 = vector.shape_cast %13 : vector<1x128x128xf32> to vector<128x128xf32>
    %cst_16 = arith.constant dense<0.000000e+00> : vector<16x128xf32>
    %15 = tpu.matmul %12, %14, %cst_16 {dimension_numbers = #tpu.dot_dimension_numbers<[1], [0], [0], [1], [0, 0, 1, 1], [], []>} : vector<16x128xf32>, vector<128x128xf32>, vector<16x128xf32> -> vector<16x128xf32>
    %16 = arith.addf %10, %15 : vector<16x128xf32>
    %c0_17 = arith.constant 0 : index
    %c0_18 = arith.constant 0 : index
    %17 = vector.load %arg4[%c0_17, %c0_18] : memref<1x128xf32, #tpu.memory_space<vmem>>, vector<1x128xf32>
    %18 = vector.broadcast %17 : vector<1x128xf32> to vector<16x128xf32>
    %19 = arith.mulf %16, %18 : vector<16x128xf32>
    %c0_19 = arith.constant 0 : index
    %c0_20 = arith.constant 0 : index
    %20 = vector.load %arg5[%c0_19, %c0_20] : memref<1x128xf32, #tpu.memory_space<vmem>>, vector<1x128xf32>
    %21 = vector.broadcast %20 : vector<1x128xf32> to vector<16x128xf32>
    %22 = arith.addf %19, %21 : vector<16x128xf32>
    %cst_21 = arith.constant 0.000000e+00 : f32
    %23 = vector.broadcast %cst_21 : f32 to vector<16x128xf32>
    %24 = arith.maximumf %22, %23 : vector<16x128xf32>
    %cst_22 = arith.constant 0.000000e+00 : f32
    %25 = vector.broadcast %cst_22 : f32 to vector<2x1x128xf32>
    %26 = vector.shape_cast %24 : vector<16x128xf32> to vector<2x8x128xf32>
    %27 = tpu.concatenate %25, %26, %25 in 1 : vector<2x1x128xf32>, vector<2x8x128xf32>, vector<2x1x128xf32> -> vector<2x10x128xf32>
    %28 = vector.extract_strided_slice %27 {offsets = [0, 0, 0], sizes = [2, 8, 128], strides = [1, 1, 1]} : vector<2x10x128xf32> to vector<2x8x128xf32>
    %29 = vector.shape_cast %28 : vector<2x8x128xf32> to vector<16x128xf32>
    %c0_23 = arith.constant 0 : index
    %c0_24 = arith.constant 0 : index
    %c0_25 = arith.constant 0 : index
    %30 = vector.load %arg3[%c0_23, %c0_24, %c0_25] : memref<3x128x128xf32, #tpu.memory_space<vmem>>, vector<1x128x128xf32>
    %31 = vector.shape_cast %30 : vector<1x128x128xf32> to vector<128x128xf32>
    %cst_26 = arith.constant dense<0.000000e+00> : vector<16x128xf32>
    %32 = tpu.matmul %29, %31, %cst_26 {dimension_numbers = #tpu.dot_dimension_numbers<[1], [0], [0], [1], [0, 0, 1, 1], [], []>} : vector<16x128xf32>, vector<128x128xf32>, vector<16x128xf32> -> vector<16x128xf32>
    %33 = vector.extract_strided_slice %27 {offsets = [0, 1, 0], sizes = [2, 8, 128], strides = [1, 1, 1]} : vector<2x10x128xf32> to vector<2x8x128xf32>
    %34 = vector.shape_cast %33 : vector<2x8x128xf32> to vector<16x128xf32>
    %c1_27 = arith.constant 1 : index
    %c0_28 = arith.constant 0 : index
    %c0_29 = arith.constant 0 : index
    %35 = vector.load %arg3[%c1_27, %c0_28, %c0_29] : memref<3x128x128xf32, #tpu.memory_space<vmem>>, vector<1x128x128xf32>
    %36 = vector.shape_cast %35 : vector<1x128x128xf32> to vector<128x128xf32>
    %cst_30 = arith.constant dense<0.000000e+00> : vector<16x128xf32>
    %37 = tpu.matmul %34, %36, %cst_30 {dimension_numbers = #tpu.dot_dimension_numbers<[1], [0], [0], [1], [0, 0, 1, 1], [], []>} : vector<16x128xf32>, vector<128x128xf32>, vector<16x128xf32> -> vector<16x128xf32>
    %38 = arith.addf %32, %37 : vector<16x128xf32>
    %39 = vector.extract_strided_slice %27 {offsets = [0, 2, 0], sizes = [2, 8, 128], strides = [1, 1, 1]} : vector<2x10x128xf32> to vector<2x8x128xf32>
    %40 = vector.shape_cast %39 : vector<2x8x128xf32> to vector<16x128xf32>
    %c2_31 = arith.constant 2 : index
    %c0_32 = arith.constant 0 : index
    %c0_33 = arith.constant 0 : index
    %41 = vector.load %arg3[%c2_31, %c0_32, %c0_33] : memref<3x128x128xf32, #tpu.memory_space<vmem>>, vector<1x128x128xf32>
    %42 = vector.shape_cast %41 : vector<1x128x128xf32> to vector<128x128xf32>
    %cst_34 = arith.constant dense<0.000000e+00> : vector<16x128xf32>
    %43 = tpu.matmul %40, %42, %cst_34 {dimension_numbers = #tpu.dot_dimension_numbers<[1], [0], [0], [1], [0, 0, 1, 1], [], []>} : vector<16x128xf32>, vector<128x128xf32>, vector<16x128xf32> -> vector<16x128xf32>
    %44 = arith.addf %38, %43 : vector<16x128xf32>
    %c0_35 = arith.constant 0 : index
    %c0_36 = arith.constant 0 : index
    %45 = vector.load %arg6[%c0_35, %c0_36] : memref<1x128xf32, #tpu.memory_space<vmem>>, vector<1x128xf32>
    %46 = vector.broadcast %45 : vector<1x128xf32> to vector<16x128xf32>
    %47 = arith.mulf %44, %46 : vector<16x128xf32>
    %c0_37 = arith.constant 0 : index
    %c0_38 = arith.constant 0 : index
    %48 = vector.load %arg7[%c0_37, %c0_38] : memref<1x128xf32, #tpu.memory_space<vmem>>, vector<1x128xf32>
    %49 = vector.broadcast %48 : vector<1x128xf32> to vector<16x128xf32>
    %50 = arith.addf %47, %49 : vector<16x128xf32>
    %51 = vector.shape_cast %50 : vector<16x128xf32> to vector<2x8x128xf32>
    %cst_39 = arith.constant dense<0.000000e+00> : vector<2x128xf32>
    %52 = vector.multi_reduction <add>, %51, %cst_39 [1] : vector<2x8x128xf32> to vector<2x128xf32>
    %c0_40 = arith.constant 0 : index
    %c0_41 = arith.constant 0 : index
    %53 = vector.load %arg11[%c0_40, %c0_41] : memref<128x16xf32, #tpu.memory_space<vmem>>, vector<128x16xf32>
    %cst_42 = arith.constant dense<0.000000e+00> : vector<2x16xf32>
    %54 = tpu.matmul %52, %53, %cst_42 {dimension_numbers = #tpu.dot_dimension_numbers<[1], [0], [0], [1], [0, 0, 1, 1], [], []>} : vector<2x128xf32>, vector<128x16xf32>, vector<2x16xf32> -> vector<2x16xf32>
    %55 = vector.shape_cast %54 : vector<2x16xf32> to vector<2x16x1xf32>
    %c0_43 = arith.constant 0 : index
    %c0_44 = arith.constant 0 : index
    %56 = vector.load %arg8[%c0_43, %c0_44] : memref<16x4xf32, #tpu.memory_space<vmem>>, vector<16x4xf32>
    %57 = vector.shape_cast %56 : vector<16x4xf32> to vector<1x16x4xf32>
    %58 = vector.broadcast %55 : vector<2x16x1xf32> to vector<2x16x4xf32>
    %59 = vector.broadcast %57 : vector<1x16x4xf32> to vector<2x16x4xf32>
    %60 = arith.mulf %58, %59 : vector<2x16x4xf32>
    %cst_45 = arith.constant dense<0.000000e+00> : vector<2x4xf32>
    %61 = vector.multi_reduction <add>, %60, %cst_45 [1] : vector<2x16x4xf32> to vector<2x4xf32>
    %cst_46 = arith.constant 0.000000e+00 : f32
    %62 = vector.broadcast %cst_46 : f32 to vector<2x4xf32>
    %63 = arith.maximumf %61, %62 : vector<2x4xf32>
    %64 = vector.shape_cast %63 : vector<2x4xf32> to vector<2x4x1xf32>
    %c0_47 = arith.constant 0 : index
    %c0_48 = arith.constant 0 : index
    %65 = vector.load %arg9[%c0_47, %c0_48] : memref<4x16xf32, #tpu.memory_space<vmem>>, vector<4x16xf32>
    %66 = vector.shape_cast %65 : vector<4x16xf32> to vector<1x4x16xf32>
    %67 = vector.broadcast %64 : vector<2x4x1xf32> to vector<2x4x16xf32>
    %68 = vector.broadcast %66 : vector<1x4x16xf32> to vector<2x4x16xf32>
    %69 = arith.mulf %67, %68 : vector<2x4x16xf32>
    %cst_49 = arith.constant dense<0.000000e+00> : vector<2x16xf32>
    %70 = vector.multi_reduction <add>, %69, %cst_49 [1] : vector<2x4x16xf32> to vector<2x16xf32>
    %71 = arith.negf %70 : vector<2x16xf32>
    %72 = math.exp %71 : vector<2x16xf32>
    %cst_50 = arith.constant 1.000000e+00 : f32
    %73 = vector.broadcast %cst_50 : f32 to vector<2x16xf32>
    %74 = arith.addf %73, %72 : vector<2x16xf32>
    %75 = arith.divf %73, %74 : vector<2x16xf32>
    %c0_51 = arith.constant 0 : index
    %c0_52 = arith.constant 0 : index
    %76 = vector.load %arg10[%c0_51, %c0_52] : memref<16x128xf32, #tpu.memory_space<vmem>>, vector<16x128xf32>
    %cst_53 = arith.constant dense<0.000000e+00> : vector<2x128xf32>
    %77 = tpu.matmul %75, %76, %cst_53 {dimension_numbers = #tpu.dot_dimension_numbers<[1], [0], [0], [1], [0, 0, 1, 1], [], []>} : vector<2x16xf32>, vector<16x128xf32>, vector<2x128xf32> -> vector<2x128xf32>
    %78 = vector.shape_cast %77 : vector<2x128xf32> to vector<2x1x128xf32>
    %79 = vector.shape_cast %78 : vector<2x1x128xf32> to vector<2x1x128xf32>
    %80 = vector.broadcast %79 : vector<2x1x128xf32> to vector<2x8x128xf32>
    %81 = vector.shape_cast %80 : vector<2x8x128xf32> to vector<16x128xf32>
    %82 = arith.mulf %50, %81 : vector<16x128xf32>
    %c1_54 = arith.constant 1 : index
    %c0_55 = arith.constant 0 : index
    %c0_56 = arith.constant 0 : index
    %83 = vector.load %arg1[%c1_54, %c0_55, %c0_56] : memref<3x16x128xf32, #tpu.memory_space<vmem>>, vector<1x16x128xf32>
    %84 = vector.shape_cast %83 : vector<1x16x128xf32> to vector<16x128xf32>
    %85 = arith.addf %82, %84 : vector<16x128xf32>
    %cst_57 = arith.constant 0.000000e+00 : f32
    %86 = vector.broadcast %cst_57 : f32 to vector<16x128xf32>
    %87 = arith.maximumf %85, %86 : vector<16x128xf32>
    %c0_58 = arith.constant 0 : index
    %c0_59 = arith.constant 0 : index
    %88 = vector.load %arg12[%c0_58, %c0_59] : memref<16x128xf32, #tpu.memory_space<vmem>>, vector<16x128xf32>
    tpu.vector_store %arg12[%c0_58, %c0_59], %87 {strides = array<i32>} : memref<16x128xf32, #tpu.memory_space<vmem>>, vector<16x128xf32>,
    return
  }
  func.func @transform_0(%arg0: i32) -> (i32, i32, i32) {
    %c0_i32 = arith.constant 0 : i32
    %c0_i32_0 = arith.constant 0 : i32
    %c0_i32_1 = arith.constant 0 : i32
    return %c0_i32, %arg0, %c0_i32_0 : i32, i32, i32
  }
  func.func @transform_1(%arg0: i32) -> (i32, i32, i32) {
    %c0_i32 = arith.constant 0 : i32
    %c0_i32_0 = arith.constant 0 : i32
    %c0_i32_1 = arith.constant 0 : i32
    %c0_i32_2 = arith.constant 0 : i32
    return %c0_i32, %c0_i32_0, %c0_i32_1 : i32, i32, i32
  }
  func.func @transform_2(%arg0: i32) -> (i32, i32, i32) {
    %c0_i32 = arith.constant 0 : i32
    %c0_i32_0 = arith.constant 0 : i32
    %c0_i32_1 = arith.constant 0 : i32
    %c0_i32_2 = arith.constant 0 : i32
    return %c0_i32, %c0_i32_0, %c0_i32_1 : i32, i32, i32
  }
  func.func @transform_3(%arg0: i32) -> (i32, i32) {
    %c0_i32 = arith.constant 0 : i32
    %c0_i32_0 = arith.constant 0 : i32
    %c0_i32_1 = arith.constant 0 : i32
    return %c0_i32, %c0_i32_0 : i32, i32
  }
  func.func @transform_4(%arg0: i32) -> (i32, i32) {
    %c0_i32 = arith.constant 0 : i32
    %c0_i32_0 = arith.constant 0 : i32
    %c0_i32_1 = arith.constant 0 : i32
    return %c0_i32, %c0_i32_0 : i32, i32
  }
  func.func @transform_5(%arg0: i32) -> (i32, i32) {
    %c0_i32 = arith.constant 0 : i32
    %c0_i32_0 = arith.constant 0 : i32
    %c0_i32_1 = arith.constant 0 : i32
    return %c0_i32, %c0_i32_0 : i32, i32
  }
  func.func @transform_6(%arg0: i32) -> (i32, i32) {
    %c0_i32 = arith.constant 0 : i32
    %c0_i32_0 = arith.constant 0 : i32
    %c0_i32_1 = arith.constant 0 : i32
    return %c0_i32, %c0_i32_0 : i32, i32
  }
  func.func @transform_7(%arg0: i32) -> (i32, i32) {
    %c0_i32 = arith.constant 0 : i32
    %c0_i32_0 = arith.constant 0 : i32
    %c0_i32_1 = arith.constant 0 : i32
    return %c0_i32, %c0_i32_0 : i32, i32
  }
  func.func @transform_8(%arg0: i32) -> (i32, i32) {
    %c0_i32 = arith.constant 0 : i32
    %c0_i32_0 = arith.constant 0 : i32
    %c0_i32_1 = arith.constant 0 : i32
    return %c0_i32, %c0_i32_0 : i32, i32
  }
  func.func @transform_9(%arg0: i32) -> (i32, i32) {
    %c0_i32 = arith.constant 0 : i32
    %c0_i32_0 = arith.constant 0 : i32
    %c0_i32_1 = arith.constant 0 : i32
    return %c0_i32, %c0_i32_0 : i32, i32
  }
  func.func @transform_10(%arg0: i32) -> (i32, i32) {
    %c0_i32 = arith.constant 0 : i32
    %c0_i32_0 = arith.constant 0 : i32
    %c0_i32_1 = arith.constant 0 : i32
    return %c0_i32, %c0_i32_0 : i32, i32
  }
  func.func @transform_11(%arg0: i32) -> (i32, i32) {
    %c0_i32 = arith.constant 0 : i32
    %c0_i32_0 = arith.constant 0 : i32
    return %arg0, %c0_i32 : i32, i32
  }
}

</mosaic_0001>

<bundles_post_ra>
// kernel: tpu_custom_call.1
= control target key start
LH: loop header
LB: loop body
LE: loop exit
PB: predicated region body
PF: predicated region fallthrough
CT: control target
= control target key end

     0   :  { %16 = vsyncpa [#allocation3], 0  ;;  %s1741_s0 = inlined_call_operand.vmem [shape: f32[3,16,128], index: 0, kind: input, shape index: {}]   ;;  %s1742_s1 = inlined_call_operand.hbm [shape: f32[3,128,128], index: 1, kind: input, shape index: {}]   ;;  %s1743_s2 = inlined_call_operand.hbm [shape: f32[3,128,128], index: 2, kind: input, shape index: {}]   ;;  %s1744_s3 = inlined_call_operand.vmem [shape: f32[1,128], index: 3, kind: input, shape index: {}]   ;;  %s1745_s4 = inlined_call_operand.vmem [shape: f32[1,128], index: 4, kind: input, shape index: {}]   ;;  %s1746_s5 = inlined_call_operand.vmem [shape: f32[1,128], index: 5, kind: input, shape index: {}]   ;;  %s1747_s6 = inlined_call_operand.vmem [shape: f32[1,128], index: 6, kind: input, shape index: {}]   ;;  %s1748_s7 = inlined_call_operand.vmem [shape: f32[16,4], index: 7, kind: input, shape index: {}]   ;;  %s1749_s8 = inlined_call_operand.vmem [shape: f32[4,16], index: 8, kind: input, shape index: {}]   ;;  %s1750_s9 = inlined_call_operand.vmem [shape: f32[16,128], index: 9, kind: input, shape index: {}]   ;;  %s1751_s10 = inlined_call_operand.vmem [shape: f32[128,16], index: 10, kind: input, shape index: {}]   ;;  %s1752_s11 = inlined_call_operand.hbm [shape: f32[16,128], index: 11, kind: output, shape index: {}]  }
   0x1   :  { %17 = vsyncpa [#allocation6], 0 }
   0x2   :  { %18 = vsyncpa [#allocation4], 0  ;;  %s1502_s17 = smov [#allocation2]  }
   0x3   :  { %s26_s18 = sshll.u32 %s1502_s17, 4  ;;  %s27_s18 = int_to_ptr.vmem [resolvable:$true] %s26_s18 }
   0x4   :  { %s1444_s19 = scalar_lea.vmem %s27_s18, 6144  ;;  %p1449_p1 = scmp.lt.s32.totalorder %s27_s18, %s27_s18 }
   0x5   :  { %p1445_p0 = scmp.ne.s32.totalorder %s27_s18, %s1444_s19  ;;  %p1450_p2 = scmp.lt.s32.totalorder %s1444_s19, %s1444_s19 }
   0x7   :  { %p1451_p3 = por %p1450_p2, %p1449_p1 }
   0x9   :  { %p1452_p4 = pnand %p1451_p3, %p1445_p0 }
   0xb   :  { %1455 = shalt.err (!%p1452_p4)
}
   0xc   :  { %s1503_s20 = smov 128   ;;  %s1504_s21 = smov 8  }
   0xd   :  { %32 = dma.hbm_to_vmem [thread:$0]  %s1742_s1, 6144, %s27_s18, [#allocation3], %s1503_s20, %s1503_s20, %s1504_s21  }
   0xe   :  { %s1505_s24 = smov [#allocation5]  }
   0xf   :  { %s38_s25 = sshll.u32 %s1505_s24, 4  ;;  %s39_s25 = int_to_ptr.vmem [resolvable:$true] %s38_s25 }
  0x10   :  { %s1464_s26 = scalar_lea.vmem %s39_s25, 6144  ;;  %p1469_p6 = scmp.lt.s32.totalorder %s39_s25, %s39_s25 }
  0x11   :  { %p1465_p5 = scmp.ne.s32.totalorder %s39_s25, %s1464_s26  ;;  %p1470_p7 = scmp.lt.s32.totalorder %s1464_s26, %s1464_s26 }
  0x13   :  { %p1471_p8 = por %p1470_p7, %p1469_p6 }
  0x15   :  { %p1472_p9 = pnand %p1471_p8, %p1465_p5 }
  0x17   :  { %1475 = shalt.err (!%p1472_p9)
}
  0x18   :  { %44 = dma.hbm_to_vmem [thread:$0]  %s1743_s2, 6144, %s39_s25, [#allocation6], %s1503_s20, %s1503_s20, %s1504_s21  }
  0x19   :  { %1496 = dma.done.wait [#allocation3], 6144  }
  0x1a   :  { %1497 = vsyncadd [#allocation3], 4294961152 }
  0x1b   :  { %1498 = dma.done.wait [#allocation6], 6144  }
  0x1c   :  { %1499 = vsyncadd [#allocation6], 4294961152  ;;  %v104_v0 = vld [vmem:[#allocation2 + $0xf8] sm:$0xff]  ;;  %v103_v2 = vld [vmem:[#allocation2 + $0xf0] sm:$0xff]  ;;  %vm378_vm0 = vcmask 1040384   ;;  %vm403_vm2 = vcmask 1046528  }
  0x1d   :  { %v84_v1 = vld [vmem:[#allocation2 + $0x78] sm:$0xff]  ;;  %1168 = vmatprep.subr.mxu0 %v104_v0  ;;  %v83_v3 = vld [vmem:[#allocation2 + $0x70] sm:$0xff]  ;;  %v102_v4 = vld [vmem:[#allocation2 + $0xe8] sm:$0xff]  ;;  %vm579_vm3 = vcmask 1045504   ;;  %vm1507_vm4 = vmmov 0   ;;  %vm730_vm5 = vcmask 1041409  }
  0x1e   :  { %1203 = vmatprep.subr.mxu1 %v84_v1  ;;  %1169 = vmatpush3.msra.mxu0 %v104_v0  ;;  %v82_v5 = vld [vmem:[#allocation2 + $0x68] sm:$0xff]  ;;  %v101_v6 = vld [vmem:[#allocation2 + $0xe0] sm:$0xff]  ;;  %v100_v8 = vld [vmem:[#allocation2 + $0xd8] sm:$0xff]  ;;  %vm831_vm6 = vcmask 31744   ;;  %vm861_vm7 = vcmask 125952   ;;  %vm893_vm8 = vcmask 130048  }
  0x1f   :  { %1204 = vmatpush3.msra.mxu1 %v84_v1  ;;  %1170 = vmatprep.subr.mxu0 %v103_v2  ;;  %v81_v7 = vld [vmem:[#allocation2 + $0x60] sm:$0xff]  ;;  %v80_v9 = vld [vmem:[#allocation2 + $0x58] sm:$0xff]  ;;  %v99_v10 = vld [vmem:[#allocation2 + $0xd0] sm:$0xff] }
  0x20   :  { %1205 = vmatprep.subr.mxu1 %v83_v3  ;;  %1171 = vmatpush3.msra.mxu0 %v103_v2  ;;  %v79_v11 = vld [vmem:[#allocation2 + $0x50] sm:$0xff]  ;;  %v98_v12 = vld [vmem:[#allocation2 + $0xc8] sm:$0xff]  ;;  %v97_v14 = vld [vmem:[#allocation2 + $0xc0] sm:$0xff] }
  0x21   :  { %1206 = vmatpush3.msra.mxu1 %v83_v3  ;;  %1172 = vmatprep.subr.mxu0 %v102_v4  ;;  %v78_v13 = vld [vmem:[#allocation2 + $0x48] sm:$0xff]  ;;  %v77_v15 = vld [vmem:[#allocation2 + $0x40] sm:$0xff]  ;;  %v96_v16 = vld [vmem:[#allocation2 + $0xb8] sm:$0xff] }
  0x22   :  { %1207 = vmatprep.subr.mxu1 %v82_v5  ;;  %1173 = vmatpush3.msra.mxu0 %v102_v4  ;;  %v76_v17 = vld [vmem:[#allocation2 + $0x38] sm:$0xff]  ;;  %v95_v18 = vld [vmem:[#allocation2 + $0xb0] sm:$0xff]  ;;  %v94_v20 = vld [vmem:[#allocation2 + $0xa8] sm:$0xff] }
  0x23   :  { %1208 = vmatpush3.msra.mxu1 %v82_v5  ;;  %1174 = vmatprep.subr.mxu0 %v101_v6  ;;  %v75_v19 = vld [vmem:[#allocation2 + $0x30] sm:$0xff]  ;;  %v74_v21 = vld [vmem:[#allocation2 + $0x28] sm:$0xff]  ;;  %v93_v22 = vld [vmem:[#allocation2 + $0xa0] sm:$0xff] }
  0x24   :  { %1209 = vmatprep.subr.mxu1 %v81_v7  ;;  %1175 = vmatpush3.msra.mxu0 %v101_v6  ;;  %v73_v23 = vld [vmem:[#allocation2 + $0x20] sm:$0xff]  ;;  %v92_v24 = vld [vmem:[#allocation2 + $0x98] sm:$0xff]  ;;  %v91_v26 = vld [vmem:[#allocation2 + $0x90] sm:$0xff] }
  0x25   :  { %1210 = vmatpush3.msra.mxu1 %v81_v7  ;;  %1176 = vmatprep.subr.mxu0 %v100_v8  ;;  %v72_v25 = vld [vmem:[#allocation2 + $0x18] sm:$0xff]  ;;  %v71_v27 = vld [vmem:[#allocation2 + $0x10] sm:$0xff]  ;;  %v90_v28 = vld [vmem:[#allocation2 + $0x88] sm:$0xff] }
  0x26   :  { %1211 = vmatprep.subr.mxu1 %v80_v9  ;;  %1177 = vmatpush3.msra.mxu0 %v100_v8  ;;  %v70_v29 = vld [vmem:[#allocation2 + $0x8] sm:$0xff]  ;;  %v89_v30 = vld [vmem:[#allocation2 + $0x80] sm:$0xff]  ;;  %v1585_v32 = vld [vmem:[%s1741_s0 + $0x10] sm:$0xff] }
  0x27   :  { %1212 = vmatpush3.msra.mxu1 %v80_v9  ;;  %1178 = vmatprep.subr.mxu0 %v99_v10  ;;  %v69_v31 = vld [vmem:[#allocation2] sm:$0xff]  ;;  %v1593_v34 = vld [vmem:[%s1741_s0 + $0x18] sm:$0xff]  ;;  %v68_v35 = vld [vmem:[%s1741_s0 + $0x8] sm:$0xff] }
  0x28   :  { %1213 = vmatprep.subr.mxu1 %v79_v11  ;;  %1179 = vmatpush3.msra.mxu0 %v99_v10  ;;  %v67_v33 = vld [vmem:[%s1741_s0] sm:$0xff]  ;;  %v274_v36 = vld [vmem:[#allocation2 + $0x178] sm:$0xff]  ;;  %v273_v38 = vld [vmem:[#allocation2 + $0x170] sm:$0xff] }
  0x29   :  { %1214 = vmatpush3.msra.mxu1 %v79_v11  ;;  %1180 = vmatprep.subr.mxu0 %v98_v12  ;;  %v1027_v37 = vld [vmem:[%s1741_s0 + $0x20] sm:$0xff]  ;;  %v272_v39 = vld [vmem:[#allocation2 + $0x168] sm:$0xff]  ;;  %v270_v41 = vld [vmem:[#allocation2 + $0x158] sm:$0xff] }
  0x2a   :  { %1215 = vmatprep.subr.mxu1 %v78_v13  ;;  %1181 = vmatpush3.msra.mxu0 %v98_v12  ;;  %v271_v40 = vld [vmem:[#allocation2 + $0x160] sm:$0xff]  ;;  %v269_v42 = vld [vmem:[#allocation2 + $0x150] sm:$0xff]  ;;  %v268_v43 = vld [vmem:[#allocation2 + $0x148] sm:$0xff] }
  0x2b   :  { %1216 = vmatpush3.msra.mxu1 %v78_v13  ;;  %1182 = vmatprep.subr.mxu0 %v97_v14  ;;  %v267_v44 = vld [vmem:[#allocation2 + $0x140] sm:$0xff]  ;;  %v266_v45 = vld [vmem:[#allocation2 + $0x138] sm:$0xff]  ;;  %v265_v46 = vld [vmem:[#allocation2 + $0x130] sm:$0xff] }
  0x2c   :  { %1217 = vmatprep.subr.mxu1 %v77_v15  ;;  %1183 = vmatpush3.msra.mxu0 %v97_v14  ;;  %v264_v47 = vld [vmem:[#allocation2 + $0x128] sm:$0xff]  ;;  %v263_v48 = vld [vmem:[#allocation2 + $0x120] sm:$0xff]  ;;  %v262_v49 = vld [vmem:[#allocation2 + $0x118] sm:$0xff] }
  0x2d   :  { %1218 = vmatpush3.msra.mxu1 %v77_v15  ;;  %1184 = vmatprep.subr.mxu0 %v96_v16  ;;  %v261_v50 = vld [vmem:[#allocation2 + $0x110] sm:$0xff]  ;;  %v260_v51 = vld [vmem:[#allocation2 + $0x108] sm:$0xff]  ;;  %v259_v52 = vld [vmem:[#allocation2 + $0x100] sm:$0xff] }
  0x2e   :  { %1219 = vmatprep.subr.mxu1 %v76_v17  ;;  %1185 = vmatpush3.msra.mxu0 %v96_v16  ;;  %v1028_v53 = vld [vmem:[%s1741_s0 + $0x28] sm:$0xff]  ;;  %v398_v54 = vld [vmem:[#allocation5 + $0x78] sm:$0xff]  ;;  %v397_v55 = vld [vmem:[#allocation5 + $0x70] sm:$0xff] }
  0x2f   :  { %1220 = vmatpush3.msra.mxu1 %v76_v17  ;;  %1186 = vmatprep.subr.mxu0 %v95_v18  ;;  %v428_v56 = vld [vmem:[#allocation5 + $0xf8] sm:$0xff]  ;;  %v427_v57 = vld [vmem:[#allocation5 + $0xf0] sm:$0xff]  ;;  %v396_v58 = vld [vmem:[#allocation5 + $0x68] sm:$0xff] }
  0x30   :  { %1221 = vmatprep.subr.mxu1 %v75_v19  ;;  %1187 = vmatpush3.msra.mxu0 %v95_v18  ;;  %v426_v59 = vld [vmem:[#allocation5 + $0xe8] sm:$0xff]  ;;  %v395_v60 = vld [vmem:[#allocation5 + $0x60] sm:$0xff]  ;;  %v394_v62 = vld [vmem:[#allocation5 + $0x58] sm:$0xff] }
  0x31   :  { %1222 = vmatpush3.msra.mxu1 %v75_v19  ;;  %1188 = vmatprep.subr.mxu0 %v94_v20  ;;  %v425_v61 = vld [vmem:[#allocation5 + $0xe0] sm:$0xff]  ;;  %v424_v63 = vld [vmem:[#allocation5 + $0xd8] sm:$0xff]  ;;  %v393_v0 = vld [vmem:[#allocation5 + $0x50] sm:$0xff] }
  0x32   :  { %1223 = vmatprep.subr.mxu1 %v74_v21  ;;  %1189 = vmatpush3.msra.mxu0 %v94_v20  ;;  %v423_v1 = vld [vmem:[#allocation5 + $0xd0] sm:$0xff]  ;;  %v392_v2 = vld [vmem:[#allocation5 + $0x48] sm:$0xff]  ;;  %v391_v4 = vld [vmem:[#allocation5 + $0x40] sm:$0xff] }
  0x33   :  { %1224 = vmatpush3.msra.mxu1 %v74_v21  ;;  %1190 = vmatprep.subr.mxu0 %v93_v22  ;;  %v422_v3 = vld [vmem:[#allocation5 + $0xc8] sm:$0xff]  ;;  %v421_v5 = vld [vmem:[#allocation5 + $0xc0] sm:$0xff]  ;;  %v390_v6 = vld [vmem:[#allocation5 + $0x38] sm:$0xff] }
  0x34   :  { %1225 = vmatprep.subr.mxu1 %v73_v23  ;;  %1191 = vmatpush3.msra.mxu0 %v93_v22  ;;  %v389_v7 = vld [vmem:[#allocation5 + $0x30] sm:$0xff]  ;;  %v420_v8 = vld [vmem:[#allocation5 + $0xb8] sm:$0xff]  ;;  %v388_v9 = vld [vmem:[#allocation5 + $0x28] sm:$0xff] }
  0x35   :  { %1226 = vmatpush3.msra.mxu1 %v73_v23  ;;  %1192 = vmatprep.subr.mxu0 %v92_v24  ;;  %v419_v10 = vld [vmem:[#allocation5 + $0xb0] sm:$0xff]  ;;  %v387_v11 = vld [vmem:[#allocation5 + $0x20] sm:$0xff]  ;;  %v418_v12 = vld [vmem:[#allocation5 + $0xa8] sm:$0xff] }
  0x36   :  { %1227 = vmatprep.subr.mxu1 %v72_v25  ;;  %1193 = vmatpush3.msra.mxu0 %v92_v24  ;;  %v386_v13 = vld [vmem:[#allocation5 + $0x18] sm:$0xff]  ;;  %v417_v14 = vld [vmem:[#allocation5 + $0xa0] sm:$0xff]  ;;  %v385_v15 = vld [vmem:[#allocation5 + $0x10] sm:$0xff] }
  0x37   :  { %1228 = vmatpush3.msra.mxu1 %v72_v25  ;;  %1194 = vmatprep.subr.mxu0 %v91_v26  ;;  %v416_v16 = vld [vmem:[#allocation5 + $0x98] sm:$0xff]  ;;  %v384_v17 = vld [vmem:[#allocation5 + $0x8] sm:$0xff]  ;;  %v415_v18 = vld [vmem:[#allocation5 + $0x90] sm:$0xff] }
  0x38   :  { %1229 = vmatprep.subr.mxu1 %v71_v27  ;;  %1195 = vmatpush3.msra.mxu0 %v91_v26  ;;  %v383_v19 = vld [vmem:[#allocation5] sm:$0xff]  ;;  %v414_v20 = vld [vmem:[#allocation5 + $0x88] sm:$0xff]  ;;  %v604_v22 = vld [vmem:[#allocation5 + $0x178] sm:$0xff] }
  0x39   :  { %1230 = vmatpush3.msra.mxu1 %v71_v27  ;;  %1196 = vmatprep.subr.mxu0 %v90_v28  ;;  %v413_v21 = vld [vmem:[#allocation5 + $0x80] sm:$0xff]  ;;  %vm1031_vm1 = vmneg %vm378_vm0 }
  0x3a   :  { %1231 = vmatprep.subr.mxu1 %v70_v29  ;;  %1197 = vmatpush3.msra.mxu0 %v90_v28 }
  0x3b   :  { %1232 = vmatpush3.msra.mxu1 %v70_v29  ;;  %1198 = vmatprep.subr.mxu0 %v89_v30  ;;  %v1029_v29 = vld [vmem:[%s1744_s3] ss:$0 sm:$0xff] }
  0x3c   :  { %1233 = vmatprep.subr.mxu1 %v69_v31  ;;  %1199 = vmatpush3.msra.mxu0 %v89_v30 }
  0x3d   :  { %1200 = vmatprep.mubr.f32.mxu0 %v1585_v32  ;;  %1234 = vmatpush3.msra.mxu1 %v69_v31 }
  0x3e   :  { %1235 = vmatprep.mubr.f32.mxu1 %v67_v33  ;;  %1201 = vmatmul.mubr.f32.vlgmr.msra.gmra.mxu0 %v1593_v34  ;;  %v1030_v33 = vld [vmem:[%s1745_s4] ss:$0 sm:$0xff] }
  0x3f   :  { %1236 = vmatmul.mubr.f32.vlgmr.msra.gmra.mxu1 %v68_v35  ;;  %1238 = vmatprep.subr.mxu0 %v274_v36 }
  0x40   :  { %1270 = vmatprep.mubr.f32.mxu0 %v1027_v37  ;;  %1239 = vmatpush3.msra.mxu0 %v274_v36 }
  0x41   :  { %1240 = vmatprep.subr.mxu0 %v273_v38  ;;  %1273 = vmatprep.subr.mxu1 %v428_v56 }
  0x42   :  { %1241 = vmatpush3.msra.mxu0 %v273_v38  ;;  %1274 = vmatpush3.msra.mxu1 %v428_v56 }
  0x43   :  { %1242 = vmatprep.subr.mxu0 %v272_v39  ;;  %1275 = vmatprep.subr.mxu1 %v427_v57 }
  0x44   :  { %1243 = vmatpush3.msra.mxu0 %v272_v39  ;;  %1276 = vmatpush3.msra.mxu1 %v427_v57  ;;  %v603_v57 = vld [vmem:[#allocation5 + $0x170] sm:$0xff] }
  0x45   :  { %1244 = vmatprep.subr.mxu0 %v271_v40  ;;  %1277 = vmatprep.subr.mxu1 %v426_v59 }
  0x46   :  { %1245 = vmatpush3.msra.mxu0 %v271_v40  ;;  %1278 = vmatpush3.msra.mxu1 %v426_v59  ;;  %v602_v59 = vld [vmem:[#allocation5 + $0x168] sm:$0xff] }
  0x47   :  { %1246 = vmatprep.subr.mxu0 %v270_v41  ;;  %1279 = vmatprep.subr.mxu1 %v425_v61 }
  0x48   :  { %1247 = vmatpush3.msra.mxu0 %v270_v41  ;;  %1280 = vmatpush3.msra.mxu1 %v425_v61  ;;  %v600_v61 = vld [vmem:[#allocation5 + $0x158] sm:$0xff] }
  0x49   :  { %1248 = vmatprep.subr.mxu0 %v269_v42  ;;  %1281 = vmatprep.subr.mxu1 %v424_v63 }
  0x4a   :  { %1249 = vmatpush3.msra.mxu0 %v269_v42  ;;  %1282 = vmatpush3.msra.mxu1 %v424_v63  ;;  %v598_v63 = vld [vmem:[#allocation5 + $0x148] sm:$0xff] }
  0x4b   :  { %1250 = vmatprep.subr.mxu0 %v268_v43  ;;  %1283 = vmatprep.subr.mxu1 %v423_v1 }
  0x4c   :  { %1251 = vmatpush3.msra.mxu0 %v268_v43  ;;  %1284 = vmatpush3.msra.mxu1 %v423_v1  ;;  %v596_v1 = vld [vmem:[#allocation5 + $0x138] sm:$0xff] }
  0x4d   :  { %1252 = vmatprep.subr.mxu0 %v267_v44  ;;  %1285 = vmatprep.subr.mxu1 %v422_v3 }
  0x4e   :  { %1253 = vmatpush3.msra.mxu0 %v267_v44  ;;  %1286 = vmatpush3.msra.mxu1 %v422_v3  ;;  %v594_v3 = vld [vmem:[#allocation5 + $0x128] sm:$0xff] }
  0x4f   :  { %1254 = vmatprep.subr.mxu0 %v266_v45  ;;  %1287 = vmatprep.subr.mxu1 %v421_v5 }
  0x50   :  { %1255 = vmatpush3.msra.mxu0 %v266_v45  ;;  %1288 = vmatpush3.msra.mxu1 %v421_v5  ;;  %v592_v5 = vld [vmem:[#allocation5 + $0x118] sm:$0xff] }
  0x51   :  { %1256 = vmatprep.subr.mxu0 %v265_v46  ;;  %1289 = vmatprep.subr.mxu1 %v420_v8 }
  0x52   :  { %1257 = vmatpush3.msra.mxu0 %v265_v46  ;;  %1290 = vmatpush3.msra.mxu1 %v420_v8  ;;  %v589_v8 = vld [vmem:[#allocation5 + $0x100] sm:$0xff] }
  0x53   :  { %1258 = vmatprep.subr.mxu0 %v264_v47  ;;  %1291 = vmatprep.subr.mxu1 %v419_v10 }
  0x54   :  { %1259 = vmatpush3.msra.mxu0 %v264_v47  ;;  %1292 = vmatpush3.msra.mxu1 %v419_v10 }
  0x55   :  { %1260 = vmatprep.subr.mxu0 %v263_v48  ;;  %1293 = vmatprep.subr.mxu1 %v418_v12 }
  0x56   :  { %1261 = vmatpush3.msra.mxu0 %v263_v48  ;;  %1294 = vmatpush3.msra.mxu1 %v418_v12  ;;  %v727_v12 = vld [vmem:[%s1751_s10 + $0x78] sm:$0xff] }
  0x57   :  { %1262 = vmatprep.subr.mxu0 %v262_v49  ;;  %1295 = vmatprep.subr.mxu1 %v417_v14 }
  0x58   :  { %1263 = vmatpush3.msra.mxu0 %v262_v49  ;;  %1296 = vmatpush3.msra.mxu1 %v417_v14  ;;  %v726_v14 = vld [vmem:[%s1751_s10 + $0x70] sm:$0xff] }
  0x59   :  { %1264 = vmatprep.subr.mxu0 %v261_v50  ;;  %1297 = vmatprep.subr.mxu1 %v416_v16 }
  0x5a   :  { %1265 = vmatpush3.msra.mxu0 %v261_v50  ;;  %1298 = vmatpush3.msra.mxu1 %v416_v16  ;;  %v724_v16 = vld [vmem:[%s1751_s10 + $0x60] sm:$0xff] }
  0x5b   :  { %1266 = vmatprep.subr.mxu0 %v260_v51  ;;  %1299 = vmatprep.subr.mxu1 %v415_v18 }
  0x5c   :  { %1267 = vmatpush3.msra.mxu0 %v260_v51  ;;  %1300 = vmatpush3.msra.mxu1 %v415_v18  ;;  %v722_v18 = vld [vmem:[%s1751_s10 + $0x50] sm:$0xff] }
  0x5d   :  { %1268 = vmatprep.subr.mxu0 %v259_v52  ;;  %1301 = vmatprep.subr.mxu1 %v414_v20 }
  0x5e   :  { %1269 = vmatpush3.msra.mxu0 %v259_v52  ;;  %1302 = vmatpush3.msra.mxu1 %v414_v20  ;;  %v720_v20 = vld [vmem:[%s1751_s10 + $0x40] sm:$0xff] }
  0x5f   :  { %1271 = vmatmul.mubr.f32.vlgmr.msra.gmra.mxu0 %v1028_v53  ;;  %1308 = vmatprep.subr.mxu0 %v398_v54 }
  0x60   :  { %1309 = vmatpush3.msra.mxu0 %v398_v54  ;;  %1303 = vmatprep.subr.mxu1 %v413_v21 }
  0x61   :  { %1310 = vmatprep.subr.mxu0 %v397_v55  ;;  %1304 = vmatpush3.msra.mxu1 %v413_v21  ;;  %v719_v21 = vld [vmem:[%s1751_s10 + $0x38] sm:$0xff] }
  0x62   :  { %1311 = vmatpush3.msra.mxu0 %v397_v55  ;;  %1343 = vmatprep.subr.mxu1 %v604_v22 }
  0x63   :  { %1312 = vmatprep.subr.mxu0 %v396_v58 }
  0x64   :  { %1313 = vmatpush3.msra.mxu0 %v396_v58 }
  0x65   :  { %1314 = vmatprep.subr.mxu0 %v395_v60 }
  0x66   :  { %1315 = vmatpush3.msra.mxu0 %v395_v60  ;;  %v601_v60 = vld [vmem:[#allocation5 + $0x160] sm:$0xff] }
  0x67   :  { %1316 = vmatprep.subr.mxu0 %v394_v62 }
  0x68   :  { %1317 = vmatpush3.msra.mxu0 %v394_v62  ;;  %v599_v62 = vld [vmem:[#allocation5 + $0x150] sm:$0xff] }
  0x69   :  { %1318 = vmatprep.subr.mxu0 %v393_v0 }
  0x6a   :  { %1319 = vmatpush3.msra.mxu0 %v393_v0  ;;  %v597_v0 = vld [vmem:[#allocation5 + $0x140] sm:$0xff] }
  0x6b   :  { %1320 = vmatprep.subr.mxu0 %v392_v2 }
  0x6c   :  { %1321 = vmatpush3.msra.mxu0 %v392_v2  ;;  %v595_v2 = vld [vmem:[#allocation5 + $0x130] sm:$0xff] }
  0x6d   :  { %1322 = vmatprep.subr.mxu0 %v391_v4 }
  0x6e   :  { %1323 = vmatpush3.msra.mxu0 %v391_v4  ;;  %v593_v4 = vld [vmem:[#allocation5 + $0x120] sm:$0xff] }
  0x6f   :  { %1324 = vmatprep.subr.mxu0 %v390_v6 }
  0x70   :  { %1325 = vmatpush3.msra.mxu0 %v390_v6  ;;  %v591_v6 = vld [vmem:[#allocation5 + $0x110] sm:$0xff] }
  0x71   :  { %1326 = vmatprep.subr.mxu0 %v389_v7 }
  0x72   :  { %1327 = vmatpush3.msra.mxu0 %v389_v7  ;;  %v590_v7 = vld [vmem:[#allocation5 + $0x108] sm:$0xff] }
  0x73   :  { %1328 = vmatprep.subr.mxu0 %v388_v9 }
  0x74   :  { %1329 = vmatpush3.msra.mxu0 %v388_v9 }
  0x75   :  { %1330 = vmatprep.subr.mxu0 %v387_v11 }
  0x76   :  { %1331 = vmatpush3.msra.mxu0 %v387_v11 }
  0x77   :  { %1332 = vmatprep.subr.mxu0 %v386_v13 }
  0x78   :  { %1333 = vmatpush3.msra.mxu0 %v386_v13  ;;  %v1506_v13 = vmov 0.0  }
  0x79   :  { %1334 = vmatprep.subr.mxu0 %v385_v15 }
  0x7a   :  { %1335 = vmatpush3.msra.mxu0 %v385_v15  ;;  %v725_v15 = vld [vmem:[%s1751_s10 + $0x68] sm:$0xff] }
  0x7b   :  { %1336 = vmatprep.subr.mxu0 %v384_v17 }
  0x7c   :  { %1337 = vmatpush3.msra.mxu0 %v384_v17  ;;  %v723_v17 = vld [vmem:[%s1751_s10 + $0x58] sm:$0xff] }
  0x7d   :  { %1338 = vmatprep.subr.mxu0 %v383_v19 }
  0x7e   :  { %1339 = vmatpush3.msra.mxu0 %v383_v19  ;;  %v721_v19 = vld [vmem:[%s1751_s10 + $0x48] sm:$0xff] }
  0x7f   :  { %1378 = vmatprep.subr.mxu0 %v1506_v13 }
  0xfe   :  { %v1202_v23 = vpop.f32.mrf.mxu0 }
  0xff   :  { %v1237_v24 = vpop.f32.mrf.mxu1 }
 0x100   :  { %v171_v25 = vpop.f32.mrf.mxu0  ;;  %v252_v27 = vadd.f32 %v1237_v24, %v1202_v23  ;;  %v717_v23 = vld [vmem:[%s1751_s10 + $0x28] sm:$0xff]  ;;  %v716_v24 = vld [vmem:[%s1751_s10 + $0x20] sm:$0xff] }
 0x101   :  { %v246_v26 = vpop.f32.mrf.mxu1 }
 0x102   :  { %v247_v30 = vadd.f32 %v246_v26, %v171_v25  ;;  %v715_v25 = vld [vmem:[%s1751_s10 + $0x18] sm:$0xff]  ;;  %v714_v26 = vld [vmem:[%s1751_s10 + $0x10] sm:$0xff] }
 0x11f   :  { %v1272_v28 = vpop.f32.mrf.mxu0 }
 0x120   :  { %v351_v31 = vadd.f32 %v1272_v28, %v252_v27  ;;  %v713_v27 = vld [vmem:[%s1751_s10 + $0x8] sm:$0xff]  ;;  %v712_v28 = vld [vmem:[%s1751_s10] sm:$0xff] }
 0x121   :  { %v341_v35 = vpop.f32.mrf.mxu0 }
 0x122   :  { %v360_v36 = vmul.f32 %v1029_v29, %v351_v31  ;;  %v350_v37 = vadd.f32 %v341_v35, %v247_v30 }
 0x124   :  { %v369_v38 = vadd.f32 %v1030_v33, %v360_v36  ;;  %v359_v39 = vmul.f32 %v1029_v29, %v350_v37  ;;  %v1035_v37 = vld [vmem:[%s1746_s5] ss:$0 sm:$0xff] }
 0x126   :  { %v371_v40 = vmax.f32 %v369_v38, 0.0  ;;  %v368_v41 = vadd.f32 %v1030_v33, %v359_v39 }
 0x128   :  { %v375_v42 = vrot.slane %v371_v40, 7  ;;  %v370_v43 = vmax.f32 %v368_v41, 0.0  ;;  %v1036_v40 = vld [vmem:[%s1747_s6] ss:$0 sm:$0xff] }
 0x12a   :  { %v374_v44 = vrot.slane %v370_v43, 7  ;;  %v1612_v45 = vsel %vm378_vm0, 0.0, %v375_v42  ;;  %v1614_v46 = vsel %vm378_vm0, %v375_v42, 0.0 }
 0x12b   :  { %v407_v49 = vrot.slane %v1612_v45, 1  ;;  %v408_v50 = vrot.slane %v1614_v46, 1  ;;  %v583_v9 = vrot.slane %v1612_v45, 2  ;;  %v584_v10 = vrot.slane %v1614_v46, 2 }
 0x12c   :  { %1340 = vmatprep.mubr.msk.f32.mxu0 %vm1031_vm1, %v374_v44  ;;  %v379_v47 = vsel %vm378_vm0, 0.0, %v374_v44  ;;  %v381_v48 = vsel %vm378_vm0, %v374_v44, 0.0 }
 0x12d   :  { %1341 = vmatmul.mubr.msk.f32.vlgmr.msra.gmra.mxu0 %vm1031_vm1, %v375_v42  ;;  %v404_v51 = vrot.slane %v379_v47, 1  ;;  %v405_v52 = vrot.slane %v381_v48, 1  ;;  %v580_v53 = vrot.slane %v379_v47, 2  ;;  %v581_v54 = vrot.slane %v381_v48, 2 }
 0x12e   :  { %v409_v56 = vsel %vm403_vm2, %v407_v49, %v408_v50  ;;  %v585_v11 = vsel %vm579_vm3, %v583_v9, %v584_v10  ;;  %1379 = vmatpush3.msra.mxu0 %v727_v12  ;;  %1410 = vmatprep.mubr.msk.f32.mxu0 %vm1507_vm4, %v1506_v13 }
 0x12f   :  { %v406_v55 = vsel %vm403_vm2, %v404_v51, %v405_v52  ;;  %v582_v58 = vsel %vm579_vm3, %v580_v53, %v581_v54  ;;  %1380 = vmatprep.subr.mxu0 %v1506_v13 }
 0x130   :  { %1305 = vmatprep.mubr.f32.mxu1 %v406_v55  ;;  %1381 = vmatpush3.msra.mxu0 %v726_v14 }
 0x131   :  { %1306 = vmatmul.mubr.f32.vlgmr.msra.gmra.mxu1 %v409_v56  ;;  %1382 = vmatprep.subr.mxu0 %v1506_v13 }
 0x132   :  { %1344 = vmatpush3.msra.mxu1 %v604_v22  ;;  %1375 = vmatprep.mubr.f32.mxu1 %v582_v58  ;;  %v718_v22 = vld [vmem:[%s1751_s10 + $0x30] sm:$0xff] }
 0x133   :  { %1345 = vmatprep.subr.mxu1 %v603_v57  ;;  %1383 = vmatpush3.msra.mxu0 %v725_v15 }
 0x134   :  { %1346 = vmatpush3.msra.mxu1 %v603_v57  ;;  %1384 = vmatprep.subr.mxu0 %v1506_v13 }
 0x135   :  { %1347 = vmatprep.subr.mxu1 %v602_v59  ;;  %1385 = vmatpush3.msra.mxu0 %v724_v16 }
 0x136   :  { %1348 = vmatpush3.msra.mxu1 %v602_v59  ;;  %1386 = vmatprep.subr.mxu0 %v1506_v13 }
 0x137   :  { %1349 = vmatprep.subr.mxu1 %v601_v60  ;;  %1387 = vmatpush3.msra.mxu0 %v723_v17 }
 0x138   :  { %1350 = vmatpush3.msra.mxu1 %v601_v60  ;;  %1388 = vmatprep.subr.mxu0 %v1506_v13  ;;  %v803_v60 = vlaneseq }
 0x139   :  { %1351 = vmatprep.subr.mxu1 %v600_v61  ;;  %1389 = vmatpush3.msra.mxu0 %v722_v18 }
 0x13a   :  { %1352 = vmatpush3.msra.mxu1 %v600_v61  ;;  %1390 = vmatprep.subr.mxu0 %v1506_v13  ;;  %v1704_v61 = vshrl.u32 %v803_v60, 7 }
 0x13b   :  { %1353 = vmatprep.subr.mxu1 %v599_v62  ;;  %1391 = vmatpush3.msra.mxu0 %v721_v19 }
 0x13c   :  { %1354 = vmatpush3.msra.mxu1 %v599_v62  ;;  %1392 = vmatprep.subr.mxu0 %v1506_v13  ;;  %v816_v62 = vsub.s32 1, %v1704_v61 }
 0x13d   :  { %1355 = vmatprep.subr.mxu1 %v598_v63  ;;  %1393 = vmatpush3.msra.mxu0 %v720_v20 }
 0x13e   :  { %1356 = vmatpush3.msra.mxu1 %v598_v63  ;;  %1394 = vmatprep.subr.mxu0 %v1506_v13  ;;  %v1708_v63 = vsub.s32 0, %v1704_v61 }
 0x13f   :  { %1357 = vmatprep.subr.mxu1 %v597_v0  ;;  %1395 = vmatpush3.msra.mxu0 %v719_v21 }
 0x140   :  { %1358 = vmatpush3.msra.mxu1 %v597_v0  ;;  %1396 = vmatprep.subr.mxu0 %v1506_v13 }
 0x141   :  { %1359 = vmatprep.subr.mxu1 %v596_v1  ;;  %1397 = vmatpush3.msra.mxu0 %v718_v22 }
 0x142   :  { %1360 = vmatpush3.msra.mxu1 %v596_v1  ;;  %1398 = vmatprep.subr.mxu0 %v1506_v13 }
 0x143   :  { %1361 = vmatprep.subr.mxu1 %v595_v2  ;;  %1399 = vmatpush3.msra.mxu0 %v717_v23 }
 0x144   :  { %1362 = vmatpush3.msra.mxu1 %v595_v2  ;;  %1400 = vmatprep.subr.mxu0 %v1506_v13 }
 0x145   :  { %1363 = vmatprep.subr.mxu1 %v594_v3  ;;  %1401 = vmatpush3.msra.mxu0 %v716_v24 }
 0x146   :  { %1364 = vmatpush3.msra.mxu1 %v594_v3  ;;  %1402 = vmatprep.subr.mxu0 %v1506_v13 }
 0x147   :  { %1365 = vmatprep.subr.mxu1 %v593_v4  ;;  %1403 = vmatpush3.msra.mxu0 %v715_v25 }
 0x148   :  { %1366 = vmatpush3.msra.mxu1 %v593_v4  ;;  %1404 = vmatprep.subr.mxu0 %v1506_v13  ;;  %v825_v4 = vld [vmem:[%s1748_s7] sm:$0xff] }
 0x149   :  { %1367 = vmatprep.subr.mxu1 %v592_v5  ;;  %1405 = vmatpush3.msra.mxu0 %v714_v26 }
 0x14a   :  { %1368 = vmatpush3.msra.mxu1 %v592_v5  ;;  %1406 = vmatprep.subr.mxu0 %v1506_v13 }
 0x14b   :  { %1369 = vmatprep.subr.mxu1 %v591_v6  ;;  %1407 = vmatpush3.msra.mxu0 %v713_v27 }
 0x14c   :  { %1370 = vmatpush3.msra.mxu1 %v591_v6  ;;  %1408 = vmatprep.subr.mxu0 %v1506_v13 }
 0x14d   :  { %1371 = vmatprep.subr.mxu1 %v590_v7  ;;  %1409 = vmatpush3.msra.mxu0 %v712_v28 }
 0x14e   :  { %1372 = vmatpush3.msra.mxu1 %v590_v7  ;;  %v826_v7 = vld [vmem:[%s1748_s7 + $0x8] sm:$0xff] }
 0x14f   :  { %1373 = vmatprep.subr.mxu1 %v589_v8 }
 0x150   :  { %1374 = vmatpush3.msra.mxu1 %v589_v8 }
 0x151   :  { %1376 = vmatmul.mubr.f32.vlgmr.msra.gmra.mxu1 %v585_v11  ;;  %1413 = vmatprep.subr.mxu1 %v1506_v13 }
 0x152   :  { %1417 = vmatprep.mubr.msk.f32.mxu1 %vm1507_vm4, %v1506_v13 }
 0x1ed   :  { %v1342_v30 = vpop.f32.mrf.mxu0 }
 0x1ef   :  { %v570_v35 = vpop.f32.mrf.mxu0 }
 0x1f1   :  { %v1307_v29 = vpop.f32.mrf.mxu1 }
 0x1f2   :  { %v576_v33 = vadd.f32 %v1342_v30, %v1307_v29 }
 0x1f3   :  { %v495_v31 = vpop.f32.mrf.mxu1 }
 0x1f4   :  { %v571_v38 = vadd.f32 %v570_v35, %v495_v31 }
 0x211   :  { %v1377_v36 = vpop.f32.mrf.mxu1 }
 0x212   :  { %v681_v39 = vadd.f32 %v1377_v36, %v576_v33 }
 0x213   :  { %v671_v41 = vpop.f32.mrf.mxu1 }
 0x214   :  { %v690_v42 = vmul.f32 %v1035_v37, %v681_v39  ;;  %v680_v43 = vadd.f32 %v671_v41, %v571_v38  ;;  %v888_v38 = vld [vmem:[%s1750_s9] sm:$0xff] }
 0x215   :  { %v858_v39 = vld [vmem:[%s1749_s8] sm:$0xf]  ;;  %s1509_s8 = smov [#allocation7]  }
 0x216   :  { %v1695_v44 = vadd.f32 %v1036_v40, %v690_v42  ;;  %v689_v45 = vmul.f32 %v1035_v37, %v680_v43  ;;  %v889_v37 = vld [vmem:[%s1750_s9 + $0x8] sm:$0xff]  ;;  %s1012_s9 = sshll.u32 %s1509_s8, 4  ;;  %s1013_s9 = int_to_ptr.vmem [resolvable:$true] %s1012_s9 }
 0x217   :  { %1414 = vmatpush3.msra.mxu1 %v889_v37  ;;  %s1476_s23 = scalar_lea.vmem %s1013_s9, 256  ;;  %p1481_p11 = scmp.lt.s32.totalorder %s1013_s9, %s1013_s9 }
 0x218   :  { %v706_v46 = vrot.slane %v1695_v44, 4  ;;  %v1698_v47 = vadd.f32 %v1036_v40, %v689_v45  ;;  %1415 = vmatprep.subr.mxu1 %v1506_v13  ;;  %p1477_p10 = scmp.ne.s32.totalorder %s1013_s9, %s1476_s23  ;;  %p1482_p12 = scmp.lt.s32.totalorder %s1476_s23, %s1476_s23 }
 0x219   :  { %1416 = vmatpush3.msra.mxu1 %v888_v38 }
 0x21a   :  { %v707_v48 = vadd.f32 %v706_v46, %v1695_v44  ;;  %v700_v49 = vrot.slane %v1698_v47, 4  ;;  %p1483_p13 = por %p1482_p12, %p1481_p11 }
 0x21c   :  { %v708_v50 = vrot.slane %v707_v48, 2  ;;  %v701_v51 = vadd.f32 %v700_v49, %v1698_v47  ;;  %p1484_p0 = pnand %p1483_p13, %p1477_p10 }
 0x21e   :  { %v702_v52 = vrot.slane %v701_v51, 2  ;;  %v709_v53 = vadd.f32 %v708_v50, %v707_v48 }
 0x220   :  { %v703_v54 = vadd.f32 %v702_v52, %v701_v51  ;;  %v710_v55 = vrot.slane %v709_v53, 1 }
 0x222   :  { %v704_v56 = vrot.slane %v703_v54, 1  ;;  %v711_v58 = vadd.f32 %v710_v55, %v709_v53 }
 0x224   :  { %v705_v57 = vadd.f32 %v704_v56, %v703_v54 }
 0x226   :  { %v731_v59 = vsel %vm730_vm5, %v711_v58, %v705_v57 }
 0x227   :  { %1411 = vmatmul.mubr.f32.vlgmr.msra.gmra.mxu0 %v731_v59 }
 0x2e7   :  { %v799_v0 = vpop.f32.mrf.mxu0 }
 0x2e8   :  { %v817_v1 = vrot.slane %v799_v0, %v816_v62  ;;  %v806_v2 = vrot.slane %v799_v0, %v1708_v63 }
 0x2e9   :  { %v1412_v3 = vpop.f32.mrf.mxu0 }
 0x2ea   :  { %819 = vbcast.lane.b32.xlu1 %v817_v1, 256  ;;  %808 = vbcast.lane.b32.xlu0 %v806_v2, 256 }
 0x2ee   :  { %823 = vbcast.lane.b32.xlu1 %v817_v1, 264  ;;  %812 = vbcast.lane.b32.xlu0 %v806_v2, 264 }
 0x35c   :  { %v820_v5 = vpop.permute.xlu1 %819  ;;  %v809_v6 = vpop.permute.xlu0 %808 }
 0x35d   :  { %v829_v8 = vmul.f32 %v825_v4, %v820_v5  ;;  %v827_v9 = vmul.f32 %v825_v4, %v809_v6  ;;  %v1508_v6 = vmov 1966171168  }
 0x35f   :  { %v841_v15 = vsel %vm831_vm6, %v829_v8, 0.0  ;;  %v832_v16 = vsel %vm831_vm6, %v827_v9, 0.0 }
 0x360   :  { %v824_v10 = vpop.permute.xlu1 %823  ;;  %v813_v11 = vpop.permute.xlu0 %812 }
 0x361   :  { %v830_v12 = vmul.f32 %v826_v7, %v824_v10  ;;  %v828_v14 = vmul.f32 %v826_v7, %v813_v11  ;;  %v968_v7 = vunpack.c.l.s4 %v1508_v6 }
 0x363   :  { %v842_v17 = vsel %vm831_vm6, %v830_v12, 0.0  ;;  %v833_v18 = vsel %vm831_vm6, %v828_v14, 0.0  ;;  %v969_v8 = vunpack.c.0.s8 %v968_v7 }
 0x364   :  { %v843_v19 = vadd.f32 %v842_v17, %v841_v15  ;;  %v834_v20 = vadd.f32 %v833_v18, %v832_v16 }
 0x365   :  { %v972_v9 = vsub.s32 %v969_v8, %v1704_v61 }
 0x366   :  { %v844_v21 = vrot.slane %v843_v19, 4  ;;  %v835_v22 = vrot.slane %v834_v20, 4 }
 0x368   :  { %v845_v23 = vadd.f32 %v844_v21, %v843_v19  ;;  %v836_v24 = vadd.f32 %v835_v22, %v834_v20 }
 0x36a   :  { %v846_v25 = vrot.slane %v845_v23, 2  ;;  %v837_v26 = vrot.slane %v836_v24, 2 }
 0x36c   :  { %v847_v27 = vadd.f32 %v846_v25, %v845_v23  ;;  %v838_v28 = vadd.f32 %v837_v26, %v836_v24 }
 0x36e   :  { %v848_v29 = vrot.slane %v847_v27, 1  ;;  %v839_v30 = vrot.slane %v838_v28, 1 }
 0x370   :  { %v849_v31 = vadd.f32 %v848_v29, %v847_v27  ;;  %v840_v33 = vadd.f32 %v839_v30, %v838_v28 }
 0x372   :  { %v851_v35 = vmax.f32 %v849_v31, 0.0  ;;  %v850_v36 = vmax.f32 %v840_v33, 0.0 }
 0x374   :  { %856 = vbcast.lane.b32.xlu1 %v851_v35, 256  ;;  %853 = vbcast.lane.b32.xlu0 %v850_v36, 256 }
 0x3e6   :  { %v857_v40 = vpop.permute.xlu1 %856  ;;  %v854_v41 = vpop.permute.xlu0 %853 }
 0x3e7   :  { %v860_v42 = vmul.f32 %v858_v39, %v857_v40  ;;  %v859_v43 = vmul.f32 %v858_v39, %v854_v41 }
 0x3e9   :  { %v869_v45 = vsel %vm861_vm7, %v860_v42, 0.0  ;;  %v862_v46 = vsel %vm861_vm7, %v859_v43, 0.0 }
 0x3ea   :  { %v870_v48 = vrot.slane %v869_v45, 4  ;;  %v863_v49 = vrot.slane %v862_v46, 4 }
 0x3ec   :  { %v871_v50 = vadd.f32 %v870_v48, %v869_v45  ;;  %v864_v51 = vadd.f32 %v863_v49, %v862_v46 }
 0x3ee   :  { %v872_v52 = vrot.slane %v871_v50, 2  ;;  %v865_v53 = vrot.slane %v864_v51, 2 }
 0x3f0   :  { %v873_v54 = vadd.f32 %v872_v52, %v871_v50  ;;  %v866_v13 = vadd.f32 %v865_v53, %v864_v51 }
 0x3f2   :  { %v874_v55 = vrot.slane %v873_v54, 1  ;;  %v867_v56 = vrot.slane %v866_v13, 1 }
 0x3f4   :  { %v875_v57 = vadd.f32 %v874_v55, %v873_v54  ;;  %v868_v58 = vadd.f32 %v867_v56, %v866_v13 }
 0x3f6   :  { %v1038_v59 = vmul.f32 -1.442695, %v875_v57  ;;  %v1037_v60 = vmul.f32 -1.442695, %v868_v58 }
 0x3f8   :  { %1428 = vpow2.f32 %v1038_v59 }
 0x3f9   :  { %1430 = vpow2.f32 %v1037_v60 }
 0x405   :  { %v1429_v62 = vpop.eup %1428 }
 0x406   :  { %v1431_v0 = vpop.eup %1430  ;;  %v883_v1 = vadd.f32 1.0, %v1429_v62 }
 0x407   :  { %v882_v2 = vadd.f32 1.0, %v1431_v0 }
 0x408   :  { %1432 = vrcp.f32 %v883_v1 }
 0x409   :  { %1434 = vrcp.f32 %v882_v2 }
 0x415   :  { %v1433_v3 = vpop.eup %1432 }
 0x416   :  { %v1435_v4 = vpop.eup %1434 }
 0x417   :  { %v892_v5 = vsel %vm730_vm5, %v1433_v3, %v1435_v4 }
 0x418   :  { %1418 = vmatmul.mubr.msk.f32.vlgmr.msra.gmra.mxu1 %vm893_vm8, %v892_v5 }
 0x4d8   :  { %v962_v10 = vpop.f32.mrf.mxu1 }
 0x4d9   :  { %v973_v11 = vrot.slane %v962_v10, %v972_v9 }
 0x4da   :  { %v1419_v12 = vpop.f32.mrf.mxu1 }
 0x4db   :  { %v974_v14 = vcombine.high %v973_v11, %v973_v11  ;;  %v981_v15 = vrot.slane %v973_v11, %v972_v9 }
 0x4dd   :  { %v988_v16 = vrot.slane %v974_v14, %v972_v9  ;;  %v992_v17 = vrot.slane %v981_v15, %v1708_v63 }
 0x4df   :  { %v996_v18 = vrot.slane %v988_v16, %v1708_v63  ;;  %v999_v19 = vmul.f32 %v992_v17, %v1698_v47 }
 0x4e1   :  { %v1000_v20 = vmul.f32 %v996_v18, %v1695_v44  ;;  %v1001_v21 = vadd.f32 %v1585_v32, %v999_v19 }
 0x4e3   :  { %v1002_v61 = vadd.f32 %v1593_v34, %v1000_v20  ;;  %v1003_v22 = vmax.f32 %v1001_v21, 0.0 }
 0x4e5   :  { %v1004_v23 = vmax.f32 %v1002_v61, 0.0  ;;  %1005 = vst [vmem:[#allocation7] sm:$0xff] %v1003_v22 }
 0x4e7   :  { %1006 = vst [vmem:[#allocation7 + $0x8] sm:$0xff] %v1004_v23 }
 0x4e8   :  { %1487 = shalt.err (!%p1484_p0)
}
 0x4e9   :  { %1018 = dma.vmem_to_hbm [thread:$0]  %s1013_s9, 256, %s1752_s11, [#allocation4], %s1503_s20, %s1503_s20, %s1504_s21  }
 0x4ea   :  { %1500 = dma.done.wait [#allocation4], 256  }
 0x4eb   :  { %1501 = vsyncadd [#allocation4], 4294967040 }
 0x4ec   :  { %1022 = vsyncpa [#allocation3], 1 }
 0x4ed   :  { %1023 = vsyncpa [#allocation6], 1 }
 0x4ee   :  { %1024 = vsyncpa [#allocation4], 1 }

</bundles_post_ra>
